<compile_context>
chip_gen: v7x
topology: tpu7x:2x2x1
jax: 0.10.0
libtpu: 0.0.40
codegen_flags: <defaults>
</compile_context>

<pallas_src>
import functools

import jax
import jax.numpy as jnp
import numpy as np
from jax.experimental import pallas as pl
from jax.experimental.pallas import tpu as pltpu


def _lstm_head_kernel(x_ref, h0_ref, c0_ref, w_ih_ref, w_hh_ref, b_ref,
                      w_lin_ref, b_lin_ref,
                      y_ref, h_out_ref, c_out_ref,
                      xw_ref, hall_ref,
                      *, seq_len, batch, hidden_dim):
    """Whole sequence in one kernel invocation."""
    H = hidden_dim
    B = batch

    # Hoisted input projection for ALL time steps (one MXU push), with the
    # combined bias folded in so it is not re-broadcast/re-added every step.
    xw_ref[...] = (
        jnp.dot(x_ref[...].astype(jnp.float32), w_ih_ref[...],
                preferred_element_type=jnp.float32)
        + b_ref[...])

    # Hoist the recurrent weight load out of the loop.
    w_hh = w_hh_ref[...]

    def step(t, carry):
        h_prev, c_prev = carry                                    # (B, H) f32
        xw_t = xw_ref[pl.ds(t * B, B), :]                          # (B, 4H)
        gates = xw_t + jnp.dot(h_prev, w_hh,
                               preferred_element_type=jnp.float32)

        # Transcendentals on full (B, 4H) vregs; lane slices only for the
        # elementwise combine.  PyTorch gate order: i, f, g, o.
        sg = jax.nn.sigmoid(gates)
        tg = jnp.tanh(gates)
        i_g = sg[:, 0 * H:1 * H]
        f_g = sg[:, 1 * H:2 * H]
        g_g = tg[:, 2 * H:3 * H]
        o_g = sg[:, 3 * H:4 * H]

        c_new = f_g * c_prev + i_g * g_g
        h_new = o_g * jnp.tanh(c_new)

        # Stage h_t for the batched linear head after the loop.
        hall_ref[pl.ds(t * B, B), :] = h_new
        return h_new, c_new

    h0 = h0_ref[...].astype(jnp.float32)
    c0 = c0_ref[...].astype(jnp.float32)
    h_n, c_n = jax.lax.fori_loop(0, seq_len, step, (h0, c0), unroll=True)

    # Batched linear head + LeakyReLU(0.01): one matmul and one store for the
    # whole sequence instead of S tiny matmuls / masked stores.
    y = (jnp.dot(hall_ref[...], w_lin_ref[...],
                 preferred_element_type=jnp.float32)
         + b_lin_ref[...])
    y = jnp.where(y >= 0, y, 0.01 * y)
    y_ref[...] = y.astype(y_ref.dtype)

    # Final recurrent state written exactly once.
    h_out_ref[...] = h_n.astype(h_out_ref.dtype)
    c_out_ref[...] = c_n.astype(c_out_ref.dtype)


def frame_feature_predictor_forward(x, states, params):
    """Pallas equivalent of FrameFeaturePredictor.forward(x, states).

    x:      (B, S, input_dim)      batch-first, like nn.LSTM(batch_first=True)
    states: (h0, c0), each (1, B, hidden_dim)
    returns (output, (h_n, c_n)) with output (B, S, input_dim),
            h_n/c_n (1, B, hidden_dim)
    """
    w_ih_t, w_hh_t, b, w_lin_t, b_lin = (
        params["w_ih_t"], params["w_hh_t"], params["b"],
        params["w_lin_t"], params["b_lin"])

    B, S, I = x.shape
    H = w_hh_t.shape[0]
    h0 = states[0][0]   # (B, H)
    c0 = states[1][0]   # (B, H)

    # Time-major flatten: row t*B + b.  (Tiny XLA relayout; keeps per-step rows
    # contiguous sublane slices inside the kernel.)
    x_flat = jnp.transpose(x, (1, 0, 2)).reshape(S * B, I)

    kernel = functools.partial(_lstm_head_kernel,
                               seq_len=S, batch=B, hidden_dim=H)

    y_flat, h_n, c_n = pl.pallas_call(
        kernel,
        out_shape=(
            jax.ShapeDtypeStruct((S * B, I), x.dtype),
            jax.ShapeDtypeStruct((B, H), x.dtype),
            jax.ShapeDtypeStruct((B, H), x.dtype),
        ),
        grid_spec=pltpu.PrefetchScalarGridSpec(
            num_scalar_prefetch=0,
            grid=(1,),                                   # single kernel step
            in_specs=[
                pl.BlockSpec((S * B, I), lambda i: (0, 0)),   # x (time-major)
                pl.BlockSpec((B, H), lambda i: (0, 0)),       # h0
                pl.BlockSpec((B, H), lambda i: (0, 0)),       # c0
                pl.BlockSpec((I, 4 * H), lambda i: (0, 0)),   # W_ih^T
                pl.BlockSpec((H, 4 * H), lambda i: (0, 0)),   # W_hh^T
                pl.BlockSpec((1, 4 * H), lambda i: (0, 0)),   # bias (b_ih+b_hh)
                pl.BlockSpec((H, I), lambda i: (0, 0)),       # W_lin^T
                pl.BlockSpec((1, I), lambda i: (0, 0)),       # b_lin
            ],
            out_specs=[
                pl.BlockSpec((S * B, I), lambda i: (0, 0)),   # y (time-major)
                pl.BlockSpec((B, H), lambda i: (0, 0)),       # h_n
                pl.BlockSpec((B, H), lambda i: (0, 0)),       # c_n
            ],
            scratch_shapes=[
                pltpu.VMEM((S * B, 4 * H), jnp.float32),      # XW (pre-projection)
                pltpu.VMEM((S * B, H), jnp.float32),          # h history
            ],
        ),
        compiler_params=pltpu.CompilerParams(
            dimension_semantics=("arbitrary",)),
    )(x_flat, h0, c0, w_ih_t, w_hh_t, b, w_lin_t, b_lin)

    output = jnp.transpose(y_flat.reshape(S, B, I), (1, 0, 2))   # back to (B, S, I)
    return output, (h_n[None], c_n[None])


def reference_forward(x, states, params):
    """Pure-JAX reference (matches PyTorch LSTM + Linear + LeakyReLU math)."""
    w_ih_t, w_hh_t, b, w_lin_t, b_lin = (
        params["w_ih_t"], params["w_hh_t"], params["b"],
        params["w_lin_t"], params["b_lin"])
    H = w_hh_t.shape[0]
    h = states[0][0]
    c = states[1][0]

    def step(carry, x_t):
        h, c = carry
        gates = x_t @ w_ih_t + h @ w_hh_t + b[0]
        i_g = jax.nn.sigmoid(gates[:, 0 * H:1 * H])
        f_g = jax.nn.sigmoid(gates[:, 1 * H:2 * H])
        g_g = jnp.tanh(gates[:, 2 * H:3 * H])
        o_g = jax.nn.sigmoid(gates[:, 3 * H:4 * H])
        c_new = f_g * c + i_g * g_g
        h_new = o_g * jnp.tanh(c_new)
        y = h_new @ w_lin_t + b_lin[0]
        y = jnp.where(y >= 0, y, 0.01 * y)
        return (h_new, c_new), y

    (h, c), ys = jax.lax.scan(step, (h, c), jnp.transpose(x, (1, 0, 2)))
    return jnp.transpose(ys, (1, 0, 2)), (h[None], c[None])


def init_params(key, input_dim, hidden_dim, dtype=jnp.float32):
    """Deterministic synthetic init mirroring nn.LSTM / nn.Linear shapes."""
    k_lstm = 1.0 / np.sqrt(hidden_dim)
    k_lin = 1.0 / np.sqrt(hidden_dim)
    ks = jax.random.split(key, 6)
    w_ih = jax.random.uniform(ks[0], (4 * hidden_dim, input_dim), dtype, -k_lstm, k_lstm)
    w_hh = jax.random.uniform(ks[1], (4 * hidden_dim, hidden_dim), dtype, -k_lstm, k_lstm)
    b_ih = jax.random.uniform(ks[2], (4 * hidden_dim,), dtype, -k_lstm, k_lstm)
    b_hh = jax.random.uniform(ks[3], (4 * hidden_dim,), dtype, -k_lstm, k_lstm)
    w_lin = jax.random.uniform(ks[4], (input_dim, hidden_dim), dtype, -k_lin, k_lin)
    b_lin = jax.random.uniform(ks[5], (input_dim,), dtype, -k_lin, k_lin)
    return {
        "w_ih_t": w_ih.T,                        # (I, 4H)
        "w_hh_t": w_hh.T,                        # (H, 4H)
        "b": (b_ih + b_hh)[None, :],             # (1, 4H)
        "w_lin_t": w_lin.T,                      # (H, I)
        "b_lin": b_lin[None, :],                 # (1, I)
    }


if __name__ == "__main__":
    B, S, INPUT_DIM, HIDDEN_DIM = 2, 8, 16, 32

    key = jax.random.PRNGKey(0)
    k_x, k_p = jax.random.split(key)

    x = jax.random.normal(k_x, (B, S, INPUT_DIM), jnp.float32)
    states = (jnp.zeros((1, B, HIDDEN_DIM), jnp.float32),
              jnp.zeros((1, B, HIDDEN_DIM), jnp.float32))
    params = init_params(k_p, INPUT_DIM, HIDDEN_DIM)

    out, (h_n, c_n) = frame_feature_predictor_forward(x, states, params)
    out = jax.block_until_ready(out)
    h_n = jax.block_until_ready(h_n)
    c_n = jax.block_until_ready(c_n)

    ref_out, (ref_h, ref_c) = reference_forward(x, states, params)

    assert out.shape == (B, S, INPUT_DIM)
    assert h_n.shape == (1, B, HIDDEN_DIM) and c_n.shape == (1, B, HIDDEN_DIM)
    np.testing.assert_allclose(np.asarray(out), np.asarray(ref_out), rtol=1e-3, atol=1e-3)
    np.testing.assert_allclose(np.asarray(h_n), np.asarray(ref_h), rtol=1e-3, atol=1e-3)
    np.testing.assert_allclose(np.asarray(c_n), np.asarray(ref_c), rtol=1e-3, atol=1e-3)

    print("KERNEL_OK")
</pallas_src>

<mosaic_0001>
module attributes {stable_mosaic.version = 11 : i64} {
  func.func @_lstm_head_kernel(%arg0: i32, %arg1: memref<16x16xf32, #tpu.memory_space<vmem>>, %arg2: memref<2x32xf32, #tpu.memory_space<vmem>>, %arg3: memref<2x32xf32, #tpu.memory_space<vmem>>, %arg4: memref<16x128xf32, #tpu.memory_space<vmem>>, %arg5: memref<32x128xf32, #tpu.memory_space<vmem>>, %arg6: memref<1x128xf32, #tpu.memory_space<vmem>>, %arg7: memref<32x16xf32, #tpu.memory_space<vmem>>, %arg8: memref<1x16xf32, #tpu.memory_space<vmem>>, %arg9: memref<16x16xf32, #tpu.memory_space<vmem>>, %arg10: memref<2x32xf32, #tpu.memory_space<vmem>>, %arg11: memref<2x32xf32, #tpu.memory_space<vmem>>, %arg12: memref<16x128xf32, #tpu.memory_space<vmem>>, %arg13: memref<16x32xf32, #tpu.memory_space<vmem>>) attributes {dimension_semantics = [#tpu.dimension_semantics<arbitrary>], iteration_bounds = array<i64: 1>, scalar_prefetch = 0 : i64, scratch_operands = 2 : i64, tpu.core_type = #tpu.core_type<tc>, window_params = [{pipeline_mode = #tpu.pipeline_mode<synchronous>, transform_indices = @transform_0, window_bounds = array<i64: 16, 16>}, {pipeline_mode = #tpu.pipeline_mode<synchronous>, transform_indices = @transform_1, window_bounds = array<i64: 2, 32>}, {pipeline_mode = #tpu.pipeline_mode<synchronous>, transform_indices = @transform_2, window_bounds = array<i64: 2, 32>}, {pipeline_mode = #tpu.pipeline_mode<synchronous>, transform_indices = @transform_3, window_bounds = array<i64: 16, 128>}, {pipeline_mode = #tpu.pipeline_mode<synchronous>, transform_indices = @transform_4, window_bounds = array<i64: 32, 128>}, {pipeline_mode = #tpu.pipeline_mode<synchronous>, transform_indices = @transform_5, window_bounds = array<i64: 1, 128>}, {pipeline_mode = #tpu.pipeline_mode<synchronous>, transform_indices = @transform_6, window_bounds = array<i64: 32, 16>}, {pipeline_mode = #tpu.pipeline_mode<synchronous>, transform_indices = @transform_7, window_bounds = array<i64: 1, 16>}, {pipeline_mode = #tpu.pipeline_mode<synchronous>, transform_indices = @transform_8, window_bounds = array<i64: 16, 16>}, {pipeline_mode = #tpu.pipeline_mode<synchronous>, transform_indices = @transform_9, window_bounds = array<i64: 2, 32>}, {pipeline_mode = #tpu.pipeline_mode<synchronous>, transform_indices = @transform_10, window_bounds = array<i64: 2, 32>}]} {
    %c0 = arith.constant 0 : index
    %c0_0 = arith.constant 0 : index
    %0 = vector.load %arg1[%c0, %c0_0] : memref<16x16xf32, #tpu.memory_space<vmem>>, vector<16x16xf32>
    %c0_1 = arith.constant 0 : index
    %c0_2 = arith.constant 0 : index
    %1 = vector.load %arg4[%c0_1, %c0_2] : memref<16x128xf32, #tpu.memory_space<vmem>>, vector<16x128xf32>
    %cst = arith.constant dense<0.000000e+00> : vector<16x128xf32>
    %2 = tpu.matmul %0, %1, %cst {dimension_numbers = #tpu.dot_dimension_numbers<[1], [0], [0], [1], [0, 0, 1, 1], [], []>} : vector<16x16xf32>, vector<16x128xf32>, vector<16x128xf32> -> vector<16x128xf32>
    %c0_3 = arith.constant 0 : index
    %c0_4 = arith.constant 0 : index
    %3 = vector.load %arg6[%c0_3, %c0_4] : memref<1x128xf32, #tpu.memory_space<vmem>>, vector<1x128xf32>
    %4 = vector.broadcast %3 : vector<1x128xf32> to vector<16x128xf32>
    %5 = arith.addf %2, %4 : vector<16x128xf32>
    %c0_5 = arith.constant 0 : index
    %c0_6 = arith.constant 0 : index
    %6 = vector.load %arg12[%c0_5, %c0_6] : memref<16x128xf32, #tpu.memory_space<vmem>>, vector<16x128xf32>
    tpu.vector_store %arg12[%c0_5, %c0_6], %5 {strides = array<i32>} : memref<16x128xf32, #tpu.memory_space<vmem>>, vector<16x128xf32>,
    %c0_7 = arith.constant 0 : index
    %c0_8 = arith.constant 0 : index
    %7 = vector.load %arg5[%c0_7, %c0_8] : memref<32x128xf32, #tpu.memory_space<vmem>>, vector<32x128xf32>
    %c0_9 = arith.constant 0 : index
    %c0_10 = arith.constant 0 : index
    %8 = vector.load %arg2[%c0_9, %c0_10] : memref<2x32xf32, #tpu.memory_space<vmem>>, vector<2x32xf32>
    %c0_11 = arith.constant 0 : index
    %c0_12 = arith.constant 0 : index
    %9 = vector.load %arg3[%c0_11, %c0_12] : memref<2x32xf32, #tpu.memory_space<vmem>>, vector<2x32xf32>
    %c0_i32 = arith.constant 0 : i32
    %c2_i32 = arith.constant 2 : i32
    %10 = arith.muli %c0_i32, %c2_i32 : i32
    %11 = arith.index_cast %10 : i32 to index
    %c0_13 = arith.constant 0 : index
    %12 = vector.load %arg12[%11, %c0_13] : memref<16x128xf32, #tpu.memory_space<vmem>>, vector<2x128xf32>
    %cst_14 = arith.constant dense<0.000000e+00> : vector<2x128xf32>
    %13 = tpu.matmul %8, %7, %cst_14 {dimension_numbers = #tpu.dot_dimension_numbers<[1], [0], [0], [1], [0, 0, 1, 1], [], []>} : vector<2x32xf32>, vector<32x128xf32>, vector<2x128xf32> -> vector<2x128xf32>
    %14 = arith.addf %12, %13 : vector<2x128xf32>
    %15 = arith.negf %14 : vector<2x128xf32>
    %16 = math.exp %15 : vector<2x128xf32>
    %cst_15 = arith.constant 1.000000e+00 : f32
    %17 = vector.broadcast %cst_15 : f32 to vector<2x128xf32>
    %18 = arith.addf %17, %16 : vector<2x128xf32>
    %19 = arith.divf %17, %18 : vector<2x128xf32>
    %20 = math.tanh %14 : vector<2x128xf32>
    %21 = vector.extract_strided_slice %19 {offsets = [0, 0], sizes = [2, 32], strides = [1, 1]} : vector<2x128xf32> to vector<2x32xf32>
    %22 = vector.extract_strided_slice %19 {offsets = [0, 32], sizes = [2, 32], strides = [1, 1]} : vector<2x128xf32> to vector<2x32xf32>
    %23 = vector.extract_strided_slice %20 {offsets = [0, 64], sizes = [2, 32], strides = [1, 1]} : vector<2x128xf32> to vector<2x32xf32>
    %24 = vector.extract_strided_slice %19 {offsets = [0, 96], sizes = [2, 32], strides = [1, 1]} : vector<2x128xf32> to vector<2x32xf32>
    %25 = arith.mulf %22, %9 : vector<2x32xf32>
    %26 = arith.mulf %21, %23 : vector<2x32xf32>
    %27 = arith.addf %25, %26 : vector<2x32xf32>
    %28 = math.tanh %27 : vector<2x32xf32>
    %29 = arith.mulf %24, %28 : vector<2x32xf32>
    %c2_i32_16 = arith.constant 2 : i32
    %30 = arith.muli %c0_i32, %c2_i32_16 : i32
    %31 = arith.index_cast %30 : i32 to index
    %c0_17 = arith.constant 0 : index
    %32 = vector.load %arg13[%31, %c0_17] : memref<16x32xf32, #tpu.memory_space<vmem>>, vector<2x32xf32>
    tpu.vector_store %arg13[%31, %c0_17], %29 {strides = array<i32>} : memref<16x32xf32, #tpu.memory_space<vmem>>, vector<2x32xf32>,
    %c1_i32 = arith.constant 1 : i32
    %c2_i32_18 = arith.constant 2 : i32
    %33 = arith.muli %c1_i32, %c2_i32_18 : i32
    %34 = arith.index_cast %33 : i32 to index
    %c0_19 = arith.constant 0 : index
    %35 = vector.load %arg12[%34, %c0_19] : memref<16x128xf32, #tpu.memory_space<vmem>>, vector<2x128xf32>
    %cst_20 = arith.constant dense<0.000000e+00> : vector<2x128xf32>
    %36 = tpu.matmul %29, %7, %cst_20 {dimension_numbers = #tpu.dot_dimension_numbers<[1], [0], [0], [1], [0, 0, 1, 1], [], []>} : vector<2x32xf32>, vector<32x128xf32>, vector<2x128xf32> -> vector<2x128xf32>
    %37 = arith.addf %35, %36 : vector<2x128xf32>
    %38 = arith.negf %37 : vector<2x128xf32>
    %39 = math.exp %38 : vector<2x128xf32>
    %cst_21 = arith.constant 1.000000e+00 : f32
    %40 = vector.broadcast %cst_21 : f32 to vector<2x128xf32>
    %41 = arith.addf %40, %39 : vector<2x128xf32>
    %42 = arith.divf %40, %41 : vector<2x128xf32>
    %43 = math.tanh %37 : vector<2x128xf32>
    %44 = vector.extract_strided_slice %42 {offsets = [0, 0], sizes = [2, 32], strides = [1, 1]} : vector<2x128xf32> to vector<2x32xf32>
    %45 = vector.extract_strided_slice %42 {offsets = [0, 32], sizes = [2, 32], strides = [1, 1]} : vector<2x128xf32> to vector<2x32xf32>
    %46 = vector.extract_strided_slice %43 {offsets = [0, 64], sizes = [2, 32], strides = [1, 1]} : vector<2x128xf32> to vector<2x32xf32>
    %47 = vector.extract_strided_slice %42 {offsets = [0, 96], sizes = [2, 32], strides = [1, 1]} : vector<2x128xf32> to vector<2x32xf32>
    %48 = arith.mulf %45, %27 : vector<2x32xf32>
    %49 = arith.mulf %44, %46 : vector<2x32xf32>
    %50 = arith.addf %48, %49 : vector<2x32xf32>
    %51 = math.tanh %50 : vector<2x32xf32>
    %52 = arith.mulf %47, %51 : vector<2x32xf32>
    %c2_i32_22 = arith.constant 2 : i32
    %53 = arith.muli %c1_i32, %c2_i32_22 : i32
    %54 = arith.index_cast %53 : i32 to index
    %c0_23 = arith.constant 0 : index
    %55 = vector.load %arg13[%54, %c0_23] : memref<16x32xf32, #tpu.memory_space<vmem>>, vector<2x32xf32>
    tpu.vector_store %arg13[%54, %c0_23], %52 {strides = array<i32>} : memref<16x32xf32, #tpu.memory_space<vmem>>, vector<2x32xf32>,
    %c2_i32_24 = arith.constant 2 : i32
    %c2_i32_25 = arith.constant 2 : i32
    %56 = arith.muli %c2_i32_24, %c2_i32_25 : i32
    %57 = arith.index_cast %56 : i32 to index
    %c0_26 = arith.constant 0 : index
    %58 = vector.load %arg12[%57, %c0_26] : memref<16x128xf32, #tpu.memory_space<vmem>>, vector<2x128xf32>
    %cst_27 = arith.constant dense<0.000000e+00> : vector<2x128xf32>
    %59 = tpu.matmul %52, %7, %cst_27 {dimension_numbers = #tpu.dot_dimension_numbers<[1], [0], [0], [1], [0, 0, 1, 1], [], []>} : vector<2x32xf32>, vector<32x128xf32>, vector<2x128xf32> -> vector<2x128xf32>
    %60 = arith.addf %58, %59 : vector<2x128xf32>
    %61 = arith.negf %60 : vector<2x128xf32>
    %62 = math.exp %61 : vector<2x128xf32>
    %cst_28 = arith.constant 1.000000e+00 : f32
    %63 = vector.broadcast %cst_28 : f32 to vector<2x128xf32>
    %64 = arith.addf %63, %62 : vector<2x128xf32>
    %65 = arith.divf %63, %64 : vector<2x128xf32>
    %66 = math.tanh %60 : vector<2x128xf32>
    %67 = vector.extract_strided_slice %65 {offsets = [0, 0], sizes = [2, 32], strides = [1, 1]} : vector<2x128xf32> to vector<2x32xf32>
    %68 = vector.extract_strided_slice %65 {offsets = [0, 32], sizes = [2, 32], strides = [1, 1]} : vector<2x128xf32> to vector<2x32xf32>
    %69 = vector.extract_strided_slice %66 {offsets = [0, 64], sizes = [2, 32], strides = [1, 1]} : vector<2x128xf32> to vector<2x32xf32>
    %70 = vector.extract_strided_slice %65 {offsets = [0, 96], sizes = [2, 32], strides = [1, 1]} : vector<2x128xf32> to vector<2x32xf32>
    %71 = arith.mulf %68, %50 : vector<2x32xf32>
    %72 = arith.mulf %67, %69 : vector<2x32xf32>
    %73 = arith.addf %71, %72 : vector<2x32xf32>
    %74 = math.tanh %73 : vector<2x32xf32>
    %75 = arith.mulf %70, %74 : vector<2x32xf32>
    %c2_i32_29 = arith.constant 2 : i32
    %76 = arith.muli %c2_i32_24, %c2_i32_29 : i32
    %77 = arith.index_cast %76 : i32 to index
    %c0_30 = arith.constant 0 : index
    %78 = vector.load %arg13[%77, %c0_30] : memref<16x32xf32, #tpu.memory_space<vmem>>, vector<2x32xf32>
    tpu.vector_store %arg13[%77, %c0_30], %75 {strides = array<i32>} : memref<16x32xf32, #tpu.memory_space<vmem>>, vector<2x32xf32>,
    %c3_i32 = arith.constant 3 : i32
    %c2_i32_31 = arith.constant 2 : i32
    %79 = arith.muli %c3_i32, %c2_i32_31 : i32
    %80 = arith.index_cast %79 : i32 to index
    %c0_32 = arith.constant 0 : index
    %81 = vector.load %arg12[%80, %c0_32] : memref<16x128xf32, #tpu.memory_space<vmem>>, vector<2x128xf32>
    %cst_33 = arith.constant dense<0.000000e+00> : vector<2x128xf32>
    %82 = tpu.matmul %75, %7, %cst_33 {dimension_numbers = #tpu.dot_dimension_numbers<[1], [0], [0], [1], [0, 0, 1, 1], [], []>} : vector<2x32xf32>, vector<32x128xf32>, vector<2x128xf32> -> vector<2x128xf32>
    %83 = arith.addf %81, %82 : vector<2x128xf32>
    %84 = arith.negf %83 : vector<2x128xf32>
    %85 = math.exp %84 : vector<2x128xf32>
    %cst_34 = arith.constant 1.000000e+00 : f32
    %86 = vector.broadcast %cst_34 : f32 to vector<2x128xf32>
    %87 = arith.addf %86, %85 : vector<2x128xf32>
    %88 = arith.divf %86, %87 : vector<2x128xf32>
    %89 = math.tanh %83 : vector<2x128xf32>
    %90 = vector.extract_strided_slice %88 {offsets = [0, 0], sizes = [2, 32], strides = [1, 1]} : vector<2x128xf32> to vector<2x32xf32>
    %91 = vector.extract_strided_slice %88 {offsets = [0, 32], sizes = [2, 32], strides = [1, 1]} : vector<2x128xf32> to vector<2x32xf32>
    %92 = vector.extract_strided_slice %89 {offsets = [0, 64], sizes = [2, 32], strides = [1, 1]} : vector<2x128xf32> to vector<2x32xf32>
    %93 = vector.extract_strided_slice %88 {offsets = [0, 96], sizes = [2, 32], strides = [1, 1]} : vector<2x128xf32> to vector<2x32xf32>
    %94 = arith.mulf %91, %73 : vector<2x32xf32>
    %95 = arith.mulf %90, %92 : vector<2x32xf32>
    %96 = arith.addf %94, %95 : vector<2x32xf32>
    %97 = math.tanh %96 : vector<2x32xf32>
    %98 = arith.mulf %93, %97 : vector<2x32xf32>
    %c2_i32_35 = arith.constant 2 : i32
    %99 = arith.muli %c3_i32, %c2_i32_35 : i32
    %100 = arith.index_cast %99 : i32 to index
    %c0_36 = arith.constant 0 : index
    %101 = vector.load %arg13[%100, %c0_36] : memref<16x32xf32, #tpu.memory_space<vmem>>, vector<2x32xf32>
    tpu.vector_store %arg13[%100, %c0_36], %98 {strides = array<i32>} : memref<16x32xf32, #tpu.memory_space<vmem>>, vector<2x32xf32>,
    %c4_i32 = arith.constant 4 : i32
    %c2_i32_37 = arith.constant 2 : i32
    %102 = arith.muli %c4_i32, %c2_i32_37 : i32
    %103 = arith.index_cast %102 : i32 to index
    %c0_38 = arith.constant 0 : index
    %104 = vector.load %arg12[%103, %c0_38] : memref<16x128xf32, #tpu.memory_space<vmem>>, vector<2x128xf32>
    %cst_39 = arith.constant dense<0.000000e+00> : vector<2x128xf32>
    %105 = tpu.matmul %98, %7, %cst_39 {dimension_numbers = #tpu.dot_dimension_numbers<[1], [0], [0], [1], [0, 0, 1, 1], [], []>} : vector<2x32xf32>, vector<32x128xf32>, vector<2x128xf32> -> vector<2x128xf32>
    %106 = arith.addf %104, %105 : vector<2x128xf32>
    %107 = arith.negf %106 : vector<2x128xf32>
    %108 = math.exp %107 : vector<2x128xf32>
    %cst_40 = arith.constant 1.000000e+00 : f32
    %109 = vector.broadcast %cst_40 : f32 to vector<2x128xf32>
    %110 = arith.addf %109, %108 : vector<2x128xf32>
    %111 = arith.divf %109, %110 : vector<2x128xf32>
    %112 = math.tanh %106 : vector<2x128xf32>
    %113 = vector.extract_strided_slice %111 {offsets = [0, 0], sizes = [2, 32], strides = [1, 1]} : vector<2x128xf32> to vector<2x32xf32>
    %114 = vector.extract_strided_slice %111 {offsets = [0, 32], sizes = [2, 32], strides = [1, 1]} : vector<2x128xf32> to vector<2x32xf32>
    %115 = vector.extract_strided_slice %112 {offsets = [0, 64], sizes = [2, 32], strides = [1, 1]} : vector<2x128xf32> to vector<2x32xf32>
    %116 = vector.extract_strided_slice %111 {offsets = [0, 96], sizes = [2, 32], strides = [1, 1]} : vector<2x128xf32> to vector<2x32xf32>
    %117 = arith.mulf %114, %96 : vector<2x32xf32>
    %118 = arith.mulf %113, %115 : vector<2x32xf32>
    %119 = arith.addf %117, %118 : vector<2x32xf32>
    %120 = math.tanh %119 : vector<2x32xf32>
    %121 = arith.mulf %116, %120 : vector<2x32xf32>
    %c2_i32_41 = arith.constant 2 : i32
    %122 = arith.muli %c4_i32, %c2_i32_41 : i32
    %123 = arith.index_cast %122 : i32 to index
    %c0_42 = arith.constant 0 : index
    %124 = vector.load %arg13[%123, %c0_42] : memref<16x32xf32, #tpu.memory_space<vmem>>, vector<2x32xf32>
    tpu.vector_store %arg13[%123, %c0_42], %121 {strides = array<i32>} : memref<16x32xf32, #tpu.memory_space<vmem>>, vector<2x32xf32>,
    %c5_i32 = arith.constant 5 : i32
    %c2_i32_43 = arith.constant 2 : i32
    %125 = arith.muli %c5_i32, %c2_i32_43 : i32
    %126 = arith.index_cast %125 : i32 to index
    %c0_44 = arith.constant 0 : index
    %127 = vector.load %arg12[%126, %c0_44] : memref<16x128xf32, #tpu.memory_space<vmem>>, vector<2x128xf32>
    %cst_45 = arith.constant dense<0.000000e+00> : vector<2x128xf32>
    %128 = tpu.matmul %121, %7, %cst_45 {dimension_numbers = #tpu.dot_dimension_numbers<[1], [0], [0], [1], [0, 0, 1, 1], [], []>} : vector<2x32xf32>, vector<32x128xf32>, vector<2x128xf32> -> vector<2x128xf32>
    %129 = arith.addf %127, %128 : vector<2x128xf32>
    %130 = arith.negf %129 : vector<2x128xf32>
    %131 = math.exp %130 : vector<2x128xf32>
    %cst_46 = arith.constant 1.000000e+00 : f32
    %132 = vector.broadcast %cst_46 : f32 to vector<2x128xf32>
    %133 = arith.addf %132, %131 : vector<2x128xf32>
    %134 = arith.divf %132, %133 : vector<2x128xf32>
    %135 = math.tanh %129 : vector<2x128xf32>
    %136 = vector.extract_strided_slice %134 {offsets = [0, 0], sizes = [2, 32], strides = [1, 1]} : vector<2x128xf32> to vector<2x32xf32>
    %137 = vector.extract_strided_slice %134 {offsets = [0, 32], sizes = [2, 32], strides = [1, 1]} : vector<2x128xf32> to vector<2x32xf32>
    %138 = vector.extract_strided_slice %135 {offsets = [0, 64], sizes = [2, 32], strides = [1, 1]} : vector<2x128xf32> to vector<2x32xf32>
    %139 = vector.extract_strided_slice %134 {offsets = [0, 96], sizes = [2, 32], strides = [1, 1]} : vector<2x128xf32> to vector<2x32xf32>
    %140 = arith.mulf %137, %119 : vector<2x32xf32>
    %141 = arith.mulf %136, %138 : vector<2x32xf32>
    %142 = arith.addf %140, %141 : vector<2x32xf32>
    %143 = math.tanh %142 : vector<2x32xf32>
    %144 = arith.mulf %139, %143 : vector<2x32xf32>
    %c2_i32_47 = arith.constant 2 : i32
    %145 = arith.muli %c5_i32, %c2_i32_47 : i32
    %146 = arith.index_cast %145 : i32 to index
    %c0_48 = arith.constant 0 : index
    %147 = vector.load %arg13[%146, %c0_48] : memref<16x32xf32, #tpu.memory_space<vmem>>, vector<2x32xf32>
    tpu.vector_store %arg13[%146, %c0_48], %144 {strides = array<i32>} : memref<16x32xf32, #tpu.memory_space<vmem>>, vector<2x32xf32>,
    %c6_i32 = arith.constant 6 : i32
    %c2_i32_49 = arith.constant 2 : i32
    %148 = arith.muli %c6_i32, %c2_i32_49 : i32
    %149 = arith.index_cast %148 : i32 to index
    %c0_50 = arith.constant 0 : index
    %150 = vector.load %arg12[%149, %c0_50] : memref<16x128xf32, #tpu.memory_space<vmem>>, vector<2x128xf32>
    %cst_51 = arith.constant dense<0.000000e+00> : vector<2x128xf32>
    %151 = tpu.matmul %144, %7, %cst_51 {dimension_numbers = #tpu.dot_dimension_numbers<[1], [0], [0], [1], [0, 0, 1, 1], [], []>} : vector<2x32xf32>, vector<32x128xf32>, vector<2x128xf32> -> vector<2x128xf32>
    %152 = arith.addf %150, %151 : vector<2x128xf32>
    %153 = arith.negf %152 : vector<2x128xf32>
    %154 = math.exp %153 : vector<2x128xf32>
    %cst_52 = arith.constant 1.000000e+00 : f32
    %155 = vector.broadcast %cst_52 : f32 to vector<2x128xf32>
    %156 = arith.addf %155, %154 : vector<2x128xf32>
    %157 = arith.divf %155, %156 : vector<2x128xf32>
    %158 = math.tanh %152 : vector<2x128xf32>
    %159 = vector.extract_strided_slice %157 {offsets = [0, 0], sizes = [2, 32], strides = [1, 1]} : vector<2x128xf32> to vector<2x32xf32>
    %160 = vector.extract_strided_slice %157 {offsets = [0, 32], sizes = [2, 32], strides = [1, 1]} : vector<2x128xf32> to vector<2x32xf32>
    %161 = vector.extract_strided_slice %158 {offsets = [0, 64], sizes = [2, 32], strides = [1, 1]} : vector<2x128xf32> to vector<2x32xf32>
    %162 = vector.extract_strided_slice %157 {offsets = [0, 96], sizes = [2, 32], strides = [1, 1]} : vector<2x128xf32> to vector<2x32xf32>
    %163 = arith.mulf %160, %142 : vector<2x32xf32>
    %164 = arith.mulf %159, %161 : vector<2x32xf32>
    %165 = arith.addf %163, %164 : vector<2x32xf32>
    %166 = math.tanh %165 : vector<2x32xf32>
    %167 = arith.mulf %162, %166 : vector<2x32xf32>
    %c2_i32_53 = arith.constant 2 : i32
    %168 = arith.muli %c6_i32, %c2_i32_53 : i32
    %169 = arith.index_cast %168 : i32 to index
    %c0_54 = arith.constant 0 : index
    %170 = vector.load %arg13[%169, %c0_54] : memref<16x32xf32, #tpu.memory_space<vmem>>, vector<2x32xf32>
    tpu.vector_store %arg13[%169, %c0_54], %167 {strides = array<i32>} : memref<16x32xf32, #tpu.memory_space<vmem>>, vector<2x32xf32>,
    %c7_i32 = arith.constant 7 : i32
    %c2_i32_55 = arith.constant 2 : i32
    %171 = arith.muli %c7_i32, %c2_i32_55 : i32
    %172 = arith.index_cast %171 : i32 to index
    %c0_56 = arith.constant 0 : index
    %173 = vector.load %arg12[%172, %c0_56] : memref<16x128xf32, #tpu.memory_space<vmem>>, vector<2x128xf32>
    %cst_57 = arith.constant dense<0.000000e+00> : vector<2x128xf32>
    %174 = tpu.matmul %167, %7, %cst_57 {dimension_numbers = #tpu.dot_dimension_numbers<[1], [0], [0], [1], [0, 0, 1, 1], [], []>} : vector<2x32xf32>, vector<32x128xf32>, vector<2x128xf32> -> vector<2x128xf32>
    %175 = arith.addf %173, %174 : vector<2x128xf32>
    %176 = arith.negf %175 : vector<2x128xf32>
    %177 = math.exp %176 : vector<2x128xf32>
    %cst_58 = arith.constant 1.000000e+00 : f32
    %178 = vector.broadcast %cst_58 : f32 to vector<2x128xf32>
    %179 = arith.addf %178, %177 : vector<2x128xf32>
    %180 = arith.divf %178, %179 : vector<2x128xf32>
    %181 = math.tanh %175 : vector<2x128xf32>
    %182 = vector.extract_strided_slice %180 {offsets = [0, 0], sizes = [2, 32], strides = [1, 1]} : vector<2x128xf32> to vector<2x32xf32>
    %183 = vector.extract_strided_slice %180 {offsets = [0, 32], sizes = [2, 32], strides = [1, 1]} : vector<2x128xf32> to vector<2x32xf32>
    %184 = vector.extract_strided_slice %181 {offsets = [0, 64], sizes = [2, 32], strides = [1, 1]} : vector<2x128xf32> to vector<2x32xf32>
    %185 = vector.extract_strided_slice %180 {offsets = [0, 96], sizes = [2, 32], strides = [1, 1]} : vector<2x128xf32> to vector<2x32xf32>
    %186 = arith.mulf %183, %165 : vector<2x32xf32>
    %187 = arith.mulf %182, %184 : vector<2x32xf32>
    %188 = arith.addf %186, %187 : vector<2x32xf32>
    %189 = math.tanh %188 : vector<2x32xf32>
    %190 = arith.mulf %185, %189 : vector<2x32xf32>
    %c2_i32_59 = arith.constant 2 : i32
    %191 = arith.muli %c7_i32, %c2_i32_59 : i32
    %192 = arith.index_cast %191 : i32 to index
    %c0_60 = arith.constant 0 : index
    %193 = vector.load %arg13[%192, %c0_60] : memref<16x32xf32, #tpu.memory_space<vmem>>, vector<2x32xf32>
    tpu.vector_store %arg13[%192, %c0_60], %190 {strides = array<i32>} : memref<16x32xf32, #tpu.memory_space<vmem>>, vector<2x32xf32>,
    %c8_i32 = arith.constant 8 : i32
    %c0_61 = arith.constant 0 : index
    %c0_62 = arith.constant 0 : index
    %194 = vector.load %arg13[%c0_61, %c0_62] : memref<16x32xf32, #tpu.memory_space<vmem>>, vector<16x32xf32>
    %c0_63 = arith.constant 0 : index
    %c0_64 = arith.constant 0 : index
    %195 = vector.load %arg7[%c0_63, %c0_64] : memref<32x16xf32, #tpu.memory_space<vmem>>, vector<32x16xf32>
    %cst_65 = arith.constant dense<0.000000e+00> : vector<16x16xf32>
    %196 = tpu.matmul %194, %195, %cst_65 {dimension_numbers = #tpu.dot_dimension_numbers<[1], [0], [0], [1], [0, 0, 1, 1], [], []>} : vector<16x32xf32>, vector<32x16xf32>, vector<16x16xf32> -> vector<16x16xf32>
    %c0_66 = arith.constant 0 : index
    %c0_67 = arith.constant 0 : index
    %197 = vector.load %arg8[%c0_66, %c0_67] : memref<1x16xf32, #tpu.memory_space<vmem>>, vector<1x16xf32>
    %198 = vector.broadcast %197 : vector<1x16xf32> to vector<16x16xf32>
    %199 = arith.addf %196, %198 : vector<16x16xf32>
    %cst_68 = arith.constant 0.000000e+00 : f32
    %200 = vector.broadcast %cst_68 : f32 to vector<16x16xf32>
    %201 = arith.cmpf oge, %199, %200 : vector<16x16xf32>
    %cst_69 = arith.constant 0.00999999977 : f32
    %202 = vector.broadcast %cst_69 : f32 to vector<16x16xf32>
    %203 = arith.mulf %202, %199 : vector<16x16xf32>
    %204 = arith.select %201, %199, %203 : vector<16x16xi1>, vector<16x16xf32>
    %c0_70 = arith.constant 0 : index
    %c0_71 = arith.constant 0 : index
    %205 = vector.load %arg9[%c0_70, %c0_71] : memref<16x16xf32, #tpu.memory_space<vmem>>, vector<16x16xf32>
    tpu.vector_store %arg9[%c0_70, %c0_71], %204 {strides = array<i32>} : memref<16x16xf32, #tpu.memory_space<vmem>>, vector<16x16xf32>,
    %c0_72 = arith.constant 0 : index
    %c0_73 = arith.constant 0 : index
    %206 = vector.load %arg10[%c0_72, %c0_73] : memref<2x32xf32, #tpu.memory_space<vmem>>, vector<2x32xf32>
    tpu.vector_store %arg10[%c0_72, %c0_73], %190 {strides = array<i32>} : memref<2x32xf32, #tpu.memory_space<vmem>>, vector<2x32xf32>,
    %c0_74 = arith.constant 0 : index
    %c0_75 = arith.constant 0 : index
    %207 = vector.load %arg11[%c0_74, %c0_75] : memref<2x32xf32, #tpu.memory_space<vmem>>, vector<2x32xf32>
    tpu.vector_store %arg11[%c0_74, %c0_75], %188 {strides = array<i32>} : memref<2x32xf32, #tpu.memory_space<vmem>>, vector<2x32xf32>,
    return
  }
  func.func @transform_0(%arg0: i32) -> (i32, i32) {
    %c0_i32 = arith.constant 0 : i32
    %c0_i32_0 = arith.constant 0 : i32
    %c0_i32_1 = arith.constant 0 : i32
    return %c0_i32, %c0_i32_0 : i32, i32
  }
  func.func @transform_1(%arg0: i32) -> (i32, i32) {
    %c0_i32 = arith.constant 0 : i32
    %c0_i32_0 = arith.constant 0 : i32
    %c0_i32_1 = arith.constant 0 : i32
    return %c0_i32, %c0_i32_0 : i32, i32
  }
  func.func @transform_2(%arg0: i32) -> (i32, i32) {
    %c0_i32 = arith.constant 0 : i32
    %c0_i32_0 = arith.constant 0 : i32
    %c0_i32_1 = arith.constant 0 : i32
    return %c0_i32, %c0_i32_0 : i32, i32
  }
  func.func @transform_3(%arg0: i32) -> (i32, i32) {
    %c0_i32 = arith.constant 0 : i32
    %c0_i32_0 = arith.constant 0 : i32
    %c0_i32_1 = arith.constant 0 : i32
    return %c0_i32, %c0_i32_0 : i32, i32
  }
  func.func @transform_4(%arg0: i32) -> (i32, i32) {
    %c0_i32 = arith.constant 0 : i32
    %c0_i32_0 = arith.constant 0 : i32
    %c0_i32_1 = arith.constant 0 : i32
    return %c0_i32, %c0_i32_0 : i32, i32
  }
  func.func @transform_5(%arg0: i32) -> (i32, i32) {
    %c0_i32 = arith.constant 0 : i32
    %c0_i32_0 = arith.constant 0 : i32
    %c0_i32_1 = arith.constant 0 : i32
    return %c0_i32, %c0_i32_0 : i32, i32
  }
  func.func @transform_6(%arg0: i32) -> (i32, i32) {
    %c0_i32 = arith.constant 0 : i32
    %c0_i32_0 = arith.constant 0 : i32
    %c0_i32_1 = arith.constant 0 : i32
    return %c0_i32, %c0_i32_0 : i32, i32
  }
  func.func @transform_7(%arg0: i32) -> (i32, i32) {
    %c0_i32 = arith.constant 0 : i32
    %c0_i32_0 = arith.constant 0 : i32
    %c0_i32_1 = arith.constant 0 : i32
    return %c0_i32, %c0_i32_0 : i32, i32
  }
  func.func @transform_8(%arg0: i32) -> (i32, i32) {
    %c0_i32 = arith.constant 0 : i32
    %c0_i32_0 = arith.constant 0 : i32
    %c0_i32_1 = arith.constant 0 : i32
    return %c0_i32, %c0_i32_0 : i32, i32
  }
  func.func @transform_9(%arg0: i32) -> (i32, i32) {
    %c0_i32 = arith.constant 0 : i32
    %c0_i32_0 = arith.constant 0 : i32
    %c0_i32_1 = arith.constant 0 : i32
    return %c0_i32, %c0_i32_0 : i32, i32
  }
  func.func @transform_10(%arg0: i32) -> (i32, i32) {
    %c0_i32 = arith.constant 0 : i32
    %c0_i32_0 = arith.constant 0 : i32
    %c0_i32_1 = arith.constant 0 : i32
    return %c0_i32, %c0_i32_0 : i32, i32
  }
}

</mosaic_0001>

<bundles_post_ra>
// kernel: tpu_custom_call.1
= control target key start
LH: loop header
LB: loop body
LE: loop exit
PB: predicated region body
PF: predicated region fallthrough
CT: control target
= control target key end

     0   :  { %16 = vsyncpa [#allocation5], 0  ;;  %s1812_s0 = inlined_call_operand.vmem [shape: f32[16,16], index: 0, kind: input, shape index: {}]   ;;  %s1813_s1 = inlined_call_operand.vmem [shape: f32[2,32], index: 1, kind: input, shape index: {}]   ;;  %s1814_s2 = inlined_call_operand.vmem [shape: f32[2,32], index: 2, kind: input, shape index: {}]   ;;  %s1815_s3 = inlined_call_operand.hbm [shape: f32[16,128], index: 3, kind: input, shape index: {}]   ;;  %s1816_s4 = inlined_call_operand.vmem [shape: f32[32,128], index: 4, kind: input, shape index: {}]   ;;  %s1817_s5 = inlined_call_operand.vmem [shape: f32[1,128], index: 5, kind: input, shape index: {}]   ;;  %s1818_s6 = inlined_call_operand.vmem [shape: f32[32,16], index: 6, kind: input, shape index: {}]   ;;  %s1819_s7 = inlined_call_operand.vmem [shape: f32[1,16], index: 7, kind: input, shape index: {}]   ;;  %s1820_s8 = inlined_call_operand.hbm [shape: f32[16,16], index: 8, kind: output, shape index: {0}]   ;;  %s1821_s9 = inlined_call_operand.hbm [shape: f32[2,32], index: 9, kind: output, shape index: {1}]   ;;  %s1822_s10 = inlined_call_operand.hbm [shape: f32[2,32], index: 10, kind: output, shape index: {2}]  }
   0x1   :  { %17 = vsyncpa [#allocation6], 0 }
   0x2   :  { %18 = vsyncpa [#allocation9], 0  ;;  %s1540_s13 = smov [#allocation4]   ;;  %s1446_s17 = scalar_lea.hbm %s1815_s3, 256 }
   0x3   :  { %s30_s14 = sshll.u32 %s1540_s13, 4  ;;  %p1447_p0 = scmp.ne.s32.totalorder %s1815_s3, %s1446_s17  ;;  %s31_s14 = int_to_ptr.vmem [resolvable:$true] %s30_s14 }
   0x4   :  { %p1450_p1 = scmp.lt.u32.totalorder %s1446_s17, %s1815_s3 }
   0x6   :  { %p1452_p2 = pnand %p1450_p1, %p1447_p0 }
   0x8   :  { %1455 = shalt.err (!%p1452_p2)
}
   0x9   :  { %s1456_s22 = scalar_lea.vmem %s31_s14, 256  ;;  %p1461_p4 = scmp.lt.s32.totalorder %s31_s14, %s31_s14 }
   0xa   :  { %p1457_p3 = scmp.ne.s32.totalorder %s31_s14, %s1456_s22  ;;  %p1462_p5 = scmp.lt.s32.totalorder %s1456_s22, %s1456_s22 }
   0xc   :  { %p1463_p6 = por %p1462_p5, %p1461_p4 }
   0xe   :  { %p1464_p7 = pnand %p1463_p6, %p1457_p3 }
  0x10   :  { %1467 = shalt.err (!%p1464_p7)
}
  0x11   :  { %s1541_s23 = smov 128   ;;  %s1542_s24 = smov 8  }
  0x12   :  { %36 = dma.hbm_to_vmem [thread:$0]  %s1815_s3, 256, %s31_s14, [#allocation5], %s1541_s23, %s1541_s23, %s1542_s24  }
  0x13   :  { %1534 = dma.done.wait [#allocation5], 256  }
  0x14   :  { %1535 = vsyncadd [#allocation5], 4294967040  ;;  %v1543_v0 = vmov 0.0|0.0   ;;  %vm1544_vm0 = vmmov 0   ;;  %v1545_v1 = vmov 0.0   ;;  %vm59_vm1 = vcmask 130048  }
  0x15   :  { %1314 = vmatprep.subr.bf16.mxu1 %v1543_v0  ;;  %1219 = vmatprep.mubr.msk.f32.mxu1 %vm1544_vm0, %v1545_v1  ;;  %v50_v2 = vld [vmem:[#allocation4] sm:$0xff]  ;;  %v51_v3 = vld [vmem:[#allocation4 + $0x8] sm:$0xff]  ;;  %v145_v9 = vld [vmem:[%s1816_s4 + $0x10] sm:$0xff]  ;;  %vm150_vm2 = vcmask 261120   ;;  %s1546_s19 = smov 64   ;;  %vm257_vm3 = vcmask 254976  }
  0x16   :  { %v48_v4 = vld [vmem:[%s1812_s0] sm:$0xff]  ;;  %v1310_v5 = vpack.c.bf16 %v51_v3, %v50_v2  ;;  %v144_v7 = vld [vmem:[%s1816_s4 + $0x8] sm:$0xff]  ;;  %v146_v10 = vld [vmem:[%s1816_s4 + $0x18] sm:$0xff] }
  0x17   :  { %1208 = vmatprep.mubr.msk.f32.mxu0 %vm59_vm1, %v48_v4  ;;  %v143_v6 = vld [vmem:[%s1816_s4] sm:$0xff]  ;;  %v49_v11 = vld [vmem:[%s1812_s0 + $0x8] sm:$0xff]  ;;  %v1647_v12 = vpack.c.bf16 %v146_v10, %v145_v9 }
  0x18   :  { %v1635_v8 = vpack.c.bf16 %v144_v7, %v143_v6  ;;  %1311 = vmatprep.subr.bf16.mxu0 %v1310_v5  ;;  %v147_v13 = vld [vmem:[%s1813_s1] sm:$0x3] }
  0x19   :  { %1313 = vmatpush3.bf16.msra.mxu0 %v1310_v5  ;;  %v1132_v14 = vld [vmem:[%s1817_s5] ss:$0 sm:$0xff]  ;;  %s1547_s5 = smov 32  }
  0x1a   :  { %1316 = vmatpush3.bf16.msra.mxu1 %v1635_v8  ;;  %1320 = vmatprep.subr.bf16.mxu0 %v1543_v0  ;;  %v148_v24 = vld [vmem:[%s1814_s2] sm:$0x3]  ;;  %s1548_s2 = smov 96  }
  0x1b   :  { %1317 = vmatprep.subr.bf16.mxu1 %v1543_v0 }
  0x1c   :  { %1209 = vmatmul.mubr.msk.f32.vlgmr.msra.gmra.mrb[0].mxu0 %vm59_vm1, %v49_v11 }
  0x1d   :  { %1322 = vmatpush3.bf16.msra.mxu0 %v1635_v8  ;;  %1230 = vmatprep.mubr.msk.f32.mxu0 %vm1544_vm0, %v1545_v1 }
  0x1e   :  { %1319 = vmatpush3.bf16.msra.mxu1 %v1647_v12  ;;  %1323 = vmatprep.subr.bf16.mxu0 %v1543_v0 }
  0x1f   :  { %1326 = vmatprep.subr.bf16.mxu1 %v1543_v0 }
  0x21   :  { %1220 = vmatmul.mubr.msk.f32.vlgmr.msra.gmra.mrb[0].mxu1 %vm150_vm2, %v147_v13  ;;  %1325 = vmatpush3.bf16.msra.mxu0 %v1647_v12 }
  0x22   :  { %1328 = vmatpush3.bf16.msra.mxu1 %v1635_v8  ;;  %1241 = vmatprep.mubr.msk.f32.mxu1 %vm1544_vm0, %v1545_v1 }
  0x23   :  { %1329 = vmatprep.subr.bf16.mxu1 %v1543_v0  ;;  %1332 = vmatprep.subr.bf16.mxu0 %v1543_v0 }
  0x26   :  { %1331 = vmatpush3.bf16.msra.mxu1 %v1647_v12 }
  0x27   :  { %1338 = vmatprep.subr.bf16.mxu1 %v1543_v0 }
  0xef   :  { %v1210_v15 = vpop.f32.mrb[0].mxu0 }
  0xf0   :  { %v138_v16 = vadd.f32 %v1210_v15, %v1132_v14  ;;  %v132_v17 = vpop.f32.mrb[1].mxu0 }
  0xf1   :  { %v133_v18 = vadd.f32 %v1132_v14, %v132_v17 }
  0xf2   :  { %142 = vst [vmem:[#allocation2 + $0x8] sm:$0xff] %v138_v16 }
  0xf3   :  { %141 = vst [vmem:[#allocation2] sm:$0xff] %v133_v18 }
  0xf4   :  { %v220_v19 = vpop.f32.mrb[0].mxu1 }
  0xf5   :  { %v1221_v20 = vpop.f32.mrb[1].mxu1 }
  0xfa   :  { %v149_v21 = vld [vmem:[#allocation2] sm:$0x3]  ;;  %v259_v39 = vld [vmem:[#allocation2 + $0x2] sm:$0x3]  ;;  %v362_v57 = vld [vmem:[#allocation2 + $0x4] sm:$0x3] }
  0xfb   :  { %v224_v22 = vadd.f32 %v220_v19, %v149_v21  ;;  %v465_v15 = vld [vmem:[#allocation2 + $0x6] sm:$0x3] }
  0xfd   :  { %1382 = vtanh.f32 %v224_v22  ;;  %v1136_v25 = vmul.f32 -1.442695, %v224_v22 }
  0xff   :  { %1384 = vpow2.f32 %v1136_v25 }
 0x107   :  { %v1383_v23 = vpop.eup %1382 }
 0x108   :  { %238 = vrot.lane.b32.xlu0 %v1383_v23, %s1546_s19 }
 0x109   :  { %v1385_v26 = vpop.eup %1384 }
 0x10a   :  { %v228_v27 = vadd.f32 1.0, %v1385_v26 }
 0x10c   :  { %233 = vrot.lane.b32.xlu0 %v148_v24, %s1547_s5  ;;  %1386 = vrcp.f32 %v228_v27 }
 0x116   :  { %v1387_v28 = vpop.eup %1386 }
 0x17a   :  { %v239_v29 = vpop.permute.xlu0 %238 }
 0x17b   :  { %v241_v30 = vmul.f32 %v1387_v28, %v239_v29 }
 0x17d   :  { %243 = vrot.lane.b32.xlu1 %v241_v30, %s1547_s5 }
 0x17e   :  { %v234_v31 = vpop.permute.xlu0 %233 }
 0x17f   :  { %v236_v32 = vmul.f32 %v1387_v28, %v234_v31 }
 0x1ef   :  { %v244_v33 = vpop.permute.xlu1 %243 }
 0x1f0   :  { %v246_v34 = vadd.f32 %v244_v33, %v236_v32  ;;  %v568_v33 = vld [vmem:[#allocation2 + $0x8] sm:$0x3] }
 0x1f2   :  { %1388 = vtanh.f32 %v246_v34 }
 0x1fc   :  { %v1389_v35 = vpop.eup %1388 }
 0x1fd   :  { %249 = vrot.lane.b32.xlu1 %v1389_v35, %s1546_s19 }
 0x26f   :  { %v250_v36 = vpop.permute.xlu1 %249 }
 0x270   :  { %v252_v37 = vmul.f32 %v1387_v28, %v250_v36 }
 0x272   :  { %254 = vrot.lane.b32.xlu0 %v252_v37, %s1547_s5 }
 0x2e4   :  { %v255_v38 = vpop.permute.xlu0 %254 }
 0x2e5   :  { %258 = vst.msk [vmem:[#allocation3] sm:$0x3] %vm257_vm3, %v255_v38  ;;  %1231 = vmatmul.mubr.msk.f32.vlgmr.msra.gmra.mrb[2].mxu0 %vm150_vm2, %v255_v38 }
 0x2e6   :  { %1334 = vmatpush3.bf16.msra.mxu0 %v1635_v8  ;;  %1252 = vmatprep.mubr.msk.f32.mxu0 %vm1544_vm0, %v1545_v1 }
 0x2e7   :  { %1335 = vmatprep.subr.bf16.mxu0 %v1543_v0 }
 0x2ea   :  { %1337 = vmatpush3.bf16.msra.mxu0 %v1647_v12 }
 0x2eb   :  { %1344 = vmatprep.subr.bf16.mxu0 %v1543_v0 }
 0x3b8   :  { %v328_v40 = vpop.f32.mrb[2].mxu0 }
 0x3b9   :  { %v332_v41 = vadd.f32 %v328_v40, %v259_v39  ;;  %v1232_v42 = vpop.f32.mrb[3].mxu0 }
 0x3bb   :  { %1390 = vtanh.f32 %v332_v41  ;;  %v1138_v44 = vmul.f32 -1.442695, %v332_v41 }
 0x3bd   :  { %1392 = vpow2.f32 %v1138_v44 }
 0x3c5   :  { %v1391_v43 = vpop.eup %1390 }
 0x3c6   :  { %342 = vrot.lane.b32.xlu1 %v1391_v43, %s1546_s19 }
 0x3c7   :  { %v1393_v45 = vpop.eup %1392 }
 0x3c8   :  { %v336_v46 = vadd.f32 1.0, %v1393_v45 }
 0x3ca   :  { %1394 = vrcp.f32 %v336_v46 }
 0x3d4   :  { %v1395_v47 = vpop.eup %1394 }
 0x3d5   :  { %v340_v50 = vmul.f32 %v1395_v47, %v246_v34 }
 0x438   :  { %v343_v48 = vpop.permute.xlu1 %342 }
 0x439   :  { %v345_v49 = vmul.f32 %v1395_v47, %v343_v48 }
 0x43b   :  { %347 = vrot.lane.b32.xlu0 %v345_v49, %s1547_s5 }
 0x4ad   :  { %v348_v51 = vpop.permute.xlu0 %347 }
 0x4ae   :  { %v350_v52 = vadd.f32 %v348_v51, %v340_v50  ;;  %v671_v51 = vld [vmem:[#allocation2 + $0xa] sm:$0x3] }
 0x4b0   :  { %1396 = vtanh.f32 %v350_v52 }
 0x4ba   :  { %v1397_v53 = vpop.eup %1396 }
 0x4bb   :  { %353 = vrot.lane.b32.xlu1 %v1397_v53, %s1546_s19 }
 0x52d   :  { %v354_v54 = vpop.permute.xlu1 %353 }
 0x52e   :  { %v356_v55 = vmul.f32 %v1395_v47, %v354_v54 }
 0x530   :  { %358 = vrot.lane.b32.xlu0 %v356_v55, %s1547_s5 }
 0x5a2   :  { %v359_v56 = vpop.permute.xlu0 %358 }
 0x5a3   :  { %361 = vst.msk [vmem:[#allocation3 + $0x2] sm:$0x3] %vm257_vm3, %v359_v56  ;;  %1242 = vmatmul.mubr.msk.f32.vlgmr.msra.gmra.mrb[2].mxu1 %vm150_vm2, %v359_v56 }
 0x5a4   :  { %1340 = vmatpush3.bf16.msra.mxu1 %v1635_v8  ;;  %1263 = vmatprep.mubr.msk.f32.mxu1 %vm1544_vm0, %v1545_v1 }
 0x5a5   :  { %1341 = vmatprep.subr.bf16.mxu1 %v1543_v0 }
 0x5a8   :  { %1343 = vmatpush3.bf16.msra.mxu1 %v1647_v12 }
 0x5a9   :  { %1350 = vmatprep.subr.bf16.mxu1 %v1543_v0 }
 0x676   :  { %v431_v58 = vpop.f32.mrb[2].mxu1 }
 0x677   :  { %v435_v59 = vadd.f32 %v431_v58, %v362_v57  ;;  %v1243_v60 = vpop.f32.mrb[3].mxu1 }
 0x679   :  { %1398 = vtanh.f32 %v435_v59  ;;  %v1140_v62 = vmul.f32 -1.442695, %v435_v59 }
 0x67b   :  { %1400 = vpow2.f32 %v1140_v62 }
 0x683   :  { %v1399_v61 = vpop.eup %1398 }
 0x684   :  { %445 = vrot.lane.b32.xlu1 %v1399_v61, %s1546_s19 }
 0x685   :  { %v1401_v63 = vpop.eup %1400 }
 0x686   :  { %v439_v2 = vadd.f32 1.0, %v1401_v63 }
 0x688   :  { %1402 = vrcp.f32 %v439_v2 }
 0x692   :  { %v1403_v3 = vpop.eup %1402 }
 0x693   :  { %v443_v6 = vmul.f32 %v1403_v3, %v350_v52 }
 0x6f6   :  { %v446_v4 = vpop.permute.xlu1 %445 }
 0x6f7   :  { %v448_v5 = vmul.f32 %v1403_v3, %v446_v4  ;;  %v774_v4 = vld [vmem:[#allocation2 + $0xc] sm:$0x3] }
 0x6f9   :  { %450 = vrot.lane.b32.xlu0 %v448_v5, %s1547_s5 }
 0x76b   :  { %v451_v7 = vpop.permute.xlu0 %450 }
 0x76c   :  { %v453_v9 = vadd.f32 %v451_v7, %v443_v6 }
 0x76e   :  { %1404 = vtanh.f32 %v453_v9 }
 0x778   :  { %v1405_v10 = vpop.eup %1404 }
 0x779   :  { %456 = vrot.lane.b32.xlu1 %v1405_v10, %s1546_s19 }
 0x7eb   :  { %v457_v11 = vpop.permute.xlu1 %456 }
 0x7ec   :  { %v459_v13 = vmul.f32 %v1403_v3, %v457_v11 }
 0x7ee   :  { %461 = vrot.lane.b32.xlu0 %v459_v13, %s1547_s5 }
 0x860   :  { %v462_v14 = vpop.permute.xlu0 %461 }
 0x861   :  { %464 = vst.msk [vmem:[#allocation3 + $0x4] sm:$0x3] %vm257_vm3, %v462_v14  ;;  %1253 = vmatmul.mubr.msk.f32.vlgmr.msra.gmra.mrb[4].mxu0 %vm150_vm2, %v462_v14 }
 0x862   :  { %1346 = vmatpush3.bf16.msra.mxu0 %v1635_v8  ;;  %1274 = vmatprep.mubr.msk.f32.mxu0 %vm1544_vm0, %v1545_v1 }
 0x863   :  { %1347 = vmatprep.subr.bf16.mxu0 %v1543_v0 }
 0x866   :  { %1349 = vmatpush3.bf16.msra.mxu0 %v1647_v12 }
 0x867   :  { %1356 = vmatprep.subr.bf16.mxu0 %v1543_v0 }
 0x934   :  { %v534_v16 = vpop.f32.mrb[4].mxu0 }
 0x935   :  { %v538_v17 = vadd.f32 %v534_v16, %v465_v15  ;;  %v1254_v18 = vpop.f32.mrb[5].mxu0 }
 0x937   :  { %1406 = vtanh.f32 %v538_v17  ;;  %v1142_v20 = vmul.f32 -1.442695, %v538_v17 }
 0x939   :  { %1408 = vpow2.f32 %v1142_v20 }
 0x941   :  { %v1407_v19 = vpop.eup %1406 }
 0x942   :  { %548 = vrot.lane.b32.xlu1 %v1407_v19, %s1546_s19 }
 0x943   :  { %v1409_v21 = vpop.eup %1408 }
 0x944   :  { %v542_v22 = vadd.f32 1.0, %v1409_v21 }
 0x946   :  { %1410 = vrcp.f32 %v542_v22 }
 0x950   :  { %v1411_v23 = vpop.eup %1410 }
 0x951   :  { %v546_v26 = vmul.f32 %v1411_v23, %v453_v9 }
 0x9b4   :  { %v549_v24 = vpop.permute.xlu1 %548 }
 0x9b5   :  { %v551_v25 = vmul.f32 %v1411_v23, %v549_v24  ;;  %v877_v24 = vld [vmem:[#allocation2 + $0xe] sm:$0x3] }
 0x9b7   :  { %553 = vrot.lane.b32.xlu0 %v551_v25, %s1547_s5 }
 0xa29   :  { %v554_v27 = vpop.permute.xlu0 %553 }
 0xa2a   :  { %v556_v28 = vadd.f32 %v554_v27, %v546_v26 }
 0xa2c   :  { %1412 = vtanh.f32 %v556_v28 }
 0xa36   :  { %v1413_v29 = vpop.eup %1412 }
 0xa37   :  { %559 = vrot.lane.b32.xlu1 %v1413_v29, %s1546_s19 }
 0xaa9   :  { %v560_v30 = vpop.permute.xlu1 %559 }
 0xaaa   :  { %v562_v31 = vmul.f32 %v1411_v23, %v560_v30 }
 0xaac   :  { %564 = vrot.lane.b32.xlu0 %v562_v31, %s1547_s5 }
 0xb1e   :  { %v565_v32 = vpop.permute.xlu0 %564 }
 0xb1f   :  { %567 = vst.msk [vmem:[#allocation3 + $0x6] sm:$0x3] %vm257_vm3, %v565_v32  ;;  %1264 = vmatmul.mubr.msk.f32.vlgmr.msra.gmra.mrb[4].mxu1 %vm150_vm2, %v565_v32 }
 0xb20   :  { %1352 = vmatpush3.bf16.msra.mxu1 %v1635_v8  ;;  %1285 = vmatprep.mubr.msk.f32.mxu1 %vm1544_vm0, %v1545_v1 }
 0xb21   :  { %1353 = vmatprep.subr.bf16.mxu1 %v1543_v0 }
 0xb24   :  { %1355 = vmatpush3.bf16.msra.mxu1 %v1647_v12 }
 0xb26   :  { %v980_v3 = vld [vmem:[#allocation3] sm:$0xff] }
 0xbf2   :  { %v637_v34 = vpop.f32.mrb[4].mxu1 }
 0xbf3   :  { %v641_v35 = vadd.f32 %v637_v34, %v568_v33  ;;  %v1265_v36 = vpop.f32.mrb[5].mxu1 }
 0xbf5   :  { %1414 = vtanh.f32 %v641_v35  ;;  %v1144_v38 = vmul.f32 -1.442695, %v641_v35 }
 0xbf7   :  { %1416 = vpow2.f32 %v1144_v38 }
 0xbff   :  { %v1415_v37 = vpop.eup %1414 }
 0xc00   :  { %651 = vrot.lane.b32.xlu1 %v1415_v37, %s1546_s19 }
 0xc01   :  { %v1417_v39 = vpop.eup %1416 }
 0xc02   :  { %v645_v40 = vadd.f32 1.0, %v1417_v39  ;;  %v982_v39 = vld [vmem:[%s1818_s6] sm:$0xff] }
 0xc04   :  { %1418 = vrcp.f32 %v645_v40  ;;  %v983_v40 = vld [vmem:[%s1818_s6 + $0x8] sm:$0xff] }
 0xc0e   :  { %v1419_v41 = vpop.eup %1418 }
 0xc0f   :  { %v649_v44 = vmul.f32 %v1419_v41, %v556_v28 }
 0xc72   :  { %v652_v42 = vpop.permute.xlu1 %651 }
 0xc73   :  { %v654_v43 = vmul.f32 %v1419_v41, %v652_v42  ;;  %v984_v42 = vld [vmem:[%s1818_s6 + $0x10] sm:$0xff] }
 0xc75   :  { %656 = vrot.lane.b32.xlu0 %v654_v43, %s1547_s5  ;;  %v985_v43 = vld [vmem:[%s1818_s6 + $0x18] sm:$0xff]  ;;  %s1549_s6 = smov [#allocation8]  }
 0xc76   :  { %s1106_s11 = sshll.u32 %s1549_s6, 4  ;;  %s1107_s11 = int_to_ptr.vmem [resolvable:$true] %s1106_s11 }
 0xc77   :  { %s1468_s12 = scalar_lea.vmem %s1107_s11, 32  ;;  %p1473_p9 = scmp.lt.s32.totalorder %s1107_s11, %s1107_s11 }
 0xc78   :  { %p1469_p8 = scmp.ne.s32.totalorder %s1107_s11, %s1468_s12  ;;  %p1474_p10 = scmp.lt.s32.totalorder %s1468_s12, %s1468_s12 }
 0xc7a   :  { %p1475_p11 = por %p1474_p10, %p1473_p9 }
 0xc7c   :  { %p1476_p12 = pnand %p1475_p11, %p1469_p8 }
 0xce7   :  { %v657_v45 = vpop.permute.xlu0 %656 }
 0xce8   :  { %v659_v46 = vadd.f32 %v657_v45, %v649_v44  ;;  %v1366_v44 = vpack.c.bf16 %v985_v43, %v984_v42 }
 0xcea   :  { %1420 = vtanh.f32 %v659_v46 }
 0xcf4   :  { %v1421_v47 = vpop.eup %1420 }
 0xcf5   :  { %662 = vrot.lane.b32.xlu1 %v1421_v47, %s1546_s19 }
 0xd67   :  { %v663_v48 = vpop.permute.xlu1 %662 }
 0xd68   :  { %v665_v49 = vmul.f32 %v1419_v41, %v663_v48  ;;  %v1362_v41 = vpack.c.bf16 %v983_v40, %v982_v39 }
 0xd6a   :  { %667 = vrot.lane.b32.xlu0 %v665_v49, %s1547_s5  ;;  %1363 = vmatprep.subr.bf16.mxu1 %v1362_v41 }
 0xddc   :  { %v668_v50 = vpop.permute.xlu0 %667 }
 0xddd   :  { %670 = vst.msk [vmem:[#allocation3 + $0x8] sm:$0x3] %vm257_vm3, %v668_v50  ;;  %1275 = vmatmul.mubr.msk.f32.vlgmr.msra.gmra.mrb[6].mxu0 %vm150_vm2, %v668_v50 }
 0xdde   :  { %1358 = vmatpush3.bf16.msra.mxu0 %v1635_v8  ;;  %1296 = vmatprep.mubr.msk.f32.mxu0 %vm1544_vm0, %v1545_v1 }
 0xddf   :  { %1359 = vmatprep.subr.bf16.mxu0 %v1543_v0 }
 0xde2   :  { %1361 = vmatpush3.bf16.msra.mxu0 %v1647_v12 }
 0xeb0   :  { %v740_v52 = vpop.f32.mrb[6].mxu0 }
 0xeb1   :  { %v744_v53 = vadd.f32 %v740_v52, %v671_v51  ;;  %v1276_v54 = vpop.f32.mrb[7].mxu0 }
 0xeb3   :  { %1422 = vtanh.f32 %v744_v53  ;;  %v1146_v56 = vmul.f32 -1.442695, %v744_v53 }
 0xeb5   :  { %1424 = vpow2.f32 %v1146_v56 }
 0xebd   :  { %v1423_v55 = vpop.eup %1422 }
 0xebe   :  { %754 = vrot.lane.b32.xlu1 %v1423_v55, %s1546_s19 }
 0xebf   :  { %v1425_v57 = vpop.eup %1424 }
 0xec0   :  { %v748_v58 = vadd.f32 1.0, %v1425_v57 }
 0xec2   :  { %1426 = vrcp.f32 %v748_v58 }
 0xecc   :  { %v1427_v8 = vpop.eup %1426 }
 0xecd   :  { %v752_v0 = vmul.f32 %v1427_v8, %v659_v46 }
 0xf30   :  { %v755_v59 = vpop.permute.xlu1 %754 }
 0xf31   :  { %v757_v1 = vmul.f32 %v1427_v8, %v755_v59 }
 0xf33   :  { %759 = vrot.lane.b32.xlu0 %v757_v1, %s1547_s5 }
 0xfa5   :  { %v760_v12 = vpop.permute.xlu0 %759 }
 0xfa6   :  { %v762_v60 = vadd.f32 %v760_v12, %v752_v0 }
 0xfa8   :  { %1428 = vtanh.f32 %v762_v60 }
 0xfb2   :  { %v1429_v61 = vpop.eup %1428 }
 0xfb3   :  { %765 = vrot.lane.b32.xlu1 %v1429_v61, %s1546_s19 }
0x1025   :  { %v766_v62 = vpop.permute.xlu1 %765 }
0x1026   :  { %v768_v63 = vmul.f32 %v1427_v8, %v766_v62 }
0x1028   :  { %770 = vrot.lane.b32.xlu0 %v768_v63, %s1547_s5 }
0x109a   :  { %v771_v2 = vpop.permute.xlu0 %770 }
0x109b   :  { %773 = vst.msk [vmem:[#allocation3 + $0xa] sm:$0x3] %vm257_vm3, %v771_v2  ;;  %1286 = vmatmul.mubr.msk.f32.vlgmr.msra.gmra.mrb[6].mxu1 %vm150_vm2, %v771_v2 }
0x109c   :  { %1307 = vmatprep.mubr.msk.f32.mxu1 %vm150_vm2, %v980_v3  ;;  %1365 = vmatpush3.bf16.msra.mxu1 %v1362_v41 }
0x109d   :  { %1367 = vmatprep.subr.bf16.mxu1 %v1366_v44 }
0x10a0   :  { %1369 = vmatpush3.bf16.msra.mxu1 %v1366_v44 }
0x116e   :  { %v843_v5 = vpop.f32.mrb[6].mxu1 }
0x116f   :  { %v847_v6 = vadd.f32 %v843_v5, %v774_v4  ;;  %v1287_v7 = vpop.f32.mrb[7].mxu1 }
0x1171   :  { %1430 = vtanh.f32 %v847_v6  ;;  %v1148_v10 = vmul.f32 -1.442695, %v847_v6 }
0x1173   :  { %1432 = vpow2.f32 %v1148_v10 }
0x117b   :  { %v1431_v9 = vpop.eup %1430 }
0x117c   :  { %857 = vrot.lane.b32.xlu1 %v1431_v9, %s1546_s19 }
0x117d   :  { %v1433_v11 = vpop.eup %1432 }
0x117e   :  { %v851_v13 = vadd.f32 1.0, %v1433_v11 }
0x1180   :  { %1434 = vrcp.f32 %v851_v13 }
0x118a   :  { %v1435_v14 = vpop.eup %1434 }
0x118b   :  { %v855_v17 = vmul.f32 %v1435_v14, %v762_v60 }
0x11ee   :  { %v858_v15 = vpop.permute.xlu1 %857 }
0x11ef   :  { %v860_v16 = vmul.f32 %v1435_v14, %v858_v15 }
0x11f1   :  { %862 = vrot.lane.b32.xlu0 %v860_v16, %s1547_s5 }
0x1263   :  { %v863_v18 = vpop.permute.xlu0 %862 }
0x1264   :  { %v865_v19 = vadd.f32 %v863_v18, %v855_v17 }
0x1266   :  { %1436 = vtanh.f32 %v865_v19 }
0x1270   :  { %v1437_v20 = vpop.eup %1436 }
0x1271   :  { %868 = vrot.lane.b32.xlu1 %v1437_v20, %s1546_s19 }
0x12e3   :  { %v869_v21 = vpop.permute.xlu1 %868 }
0x12e4   :  { %v871_v22 = vmul.f32 %v1435_v14, %v869_v21 }
0x12e6   :  { %873 = vrot.lane.b32.xlu0 %v871_v22, %s1547_s5 }
0x1358   :  { %v874_v23 = vpop.permute.xlu0 %873 }
0x1359   :  { %876 = vst.msk [vmem:[#allocation3 + $0xc] sm:$0x3] %vm257_vm3, %v874_v23  ;;  %1297 = vmatmul.mubr.msk.f32.vlgmr.msra.gmra.mrb[8].mxu0 %vm150_vm2, %v874_v23 }
0x142c   :  { %v946_v25 = vpop.f32.mrb[8].mxu0 }
0x142d   :  { %v950_v26 = vadd.f32 %v946_v25, %v877_v24  ;;  %v1298_v27 = vpop.f32.mrb[9].mxu0 }
0x142f   :  { %1438 = vtanh.f32 %v950_v26  ;;  %v1150_v29 = vmul.f32 -1.442695, %v950_v26 }
0x1431   :  { %1440 = vpow2.f32 %v1150_v29 }
0x1439   :  { %v1439_v28 = vpop.eup %1438 }
0x143a   :  { %960 = vrot.lane.b32.xlu1 %v1439_v28, %s1546_s19 }
0x143b   :  { %v1441_v30 = vpop.eup %1440 }
0x143c   :  { %v954_v31 = vadd.f32 1.0, %v1441_v30 }
0x143e   :  { %1442 = vrcp.f32 %v954_v31 }
0x1448   :  { %v1443_v32 = vpop.eup %1442 }
0x1449   :  { %v958_v35 = vmul.f32 %v1443_v32, %v865_v19 }
0x14ac   :  { %v961_v33 = vpop.permute.xlu1 %960 }
0x14ad   :  { %v963_v34 = vmul.f32 %v1443_v32, %v961_v33 }
0x14af   :  { %965 = vrot.lane.b32.xlu0 %v963_v34, %s1547_s5 }
0x1521   :  { %v966_v36 = vpop.permute.xlu0 %965 }
0x1522   :  { %v968_v37 = vadd.f32 %v966_v36, %v958_v35 }
0x1524   :  { %1444 = vtanh.f32 %v968_v37 }
0x152e   :  { %v1445_v38 = vpop.eup %1444 }
0x152f   :  { %971 = vrot.lane.b32.xlu1 %v1445_v38, %s1546_s19 }
0x1533   :  { %1084 = vrot.lane.b32.xlu1 %v968_v37, %s1548_s2 }
0x15a1   :  { %v972_v45 = vpop.permute.xlu1 %971 }
0x15a2   :  { %v974_v46 = vmul.f32 %v1443_v32, %v972_v45 }
0x15a4   :  { %976 = vrot.lane.b32.xlu0 %v974_v46, %s1547_s5 }
0x15a5   :  { %v1085_v47 = vpop.permute.xlu1 %1084 }
0x15a6   :  { %1087 = vst.msk [vmem:[#allocation10] sm:$0x3] %vm257_vm3, %v1085_v47 }
0x1616   :  { %v977_v48 = vpop.permute.xlu0 %976 }
0x1617   :  { %979 = vst.msk [vmem:[#allocation3 + $0xe] sm:$0x3] %vm257_vm3, %v977_v48  ;;  %1082 = vst.msk [vmem:[#allocation8] sm:$0x3] %vm257_vm3, %v977_v48 }
0x161e   :  { %v981_v49 = vld [vmem:[#allocation3 + $0x8] sm:$0xff] }
0x161f   :  { %1308 = vmatmul.mubr.msk.f32.vlgmr.msra.gmra.mrb[8].mxu1 %vm150_vm2, %v981_v49 }
0x1620   :  { %1479 = shalt.err (!%p1476_p12)
}
0x1621   :  { %s1480_s15 = scalar_lea.hbm %s1821_s9, 32 }
0x1622   :  { %p1481_p13 = scmp.ne.s32.totalorder %s1821_s9, %s1480_s15  ;;  %p1484_p0 = scmp.lt.u32.totalorder %s1480_s15, %s1821_s9 }
0x1624   :  { %p1486_p1 = pnand %p1484_p0, %p1481_p13 }
0x1626   :  { %1489 = shalt.err (!%p1486_p1)
}
0x1627   :  { %1109 = dma.vmem_to_hbm [thread:$0]  %s1107_s11, 32, %s1821_s9, [#allocation9]  }
0x1628   :  { %s1550_s19 = smov [#allocation10]  }
0x1629   :  { %s1116_s20 = sshll.u32 %s1550_s19, 4  ;;  %s1117_s20 = int_to_ptr.vmem [resolvable:$true] %s1116_s20 }
0x162a   :  { %s1490_s21 = scalar_lea.vmem %s1117_s20, 32  ;;  %p1495_p3 = scmp.lt.s32.totalorder %s1117_s20, %s1117_s20 }
0x162b   :  { %p1491_p2 = scmp.ne.s32.totalorder %s1117_s20, %s1490_s21  ;;  %p1496_p4 = scmp.lt.s32.totalorder %s1490_s21, %s1490_s21 }
0x162d   :  { %p1497_p5 = por %p1496_p4, %p1495_p3 }
0x162f   :  { %p1498_p6 = pnand %p1497_p5, %p1491_p2 }
0x1631   :  { %1501 = shalt.err (!%p1498_p6)
}
0x1632   :  { %s1502_s22 = scalar_lea.hbm %s1822_s10, 32 }
0x1633   :  { %p1503_p7 = scmp.ne.s32.totalorder %s1822_s10, %s1502_s22  ;;  %p1506_p8 = scmp.lt.u32.totalorder %s1502_s22, %s1822_s10 }
0x1635   :  { %p1508_p9 = pnand %p1506_p8, %p1503_p7 }
0x1637   :  { %1511 = shalt.err (!%p1508_p9)
}
0x1638   :  { %1119 = dma.vmem_to_hbm [thread:$0]  %s1117_s20, 32, %s1822_s10, [#allocation9]   ;;  %v1151_v50 = vld [vmem:[%s1819_s7] ss:$0 sm:$0xff] }
0x1639   :  { %s1551_s6 = smov [#allocation7]  }
0x163a   :  { %s1093_s11 = sshll.u32 %s1551_s6, 4  ;;  %s1094_s11 = int_to_ptr.vmem [resolvable:$true] %s1093_s11 }
0x163b   :  { %s1512_s10 = scalar_lea.vmem %s1094_s11, 256  ;;  %p1517_p11 = scmp.lt.s32.totalorder %s1094_s11, %s1094_s11 }
0x163c   :  { %p1513_p10 = scmp.ne.s32.totalorder %s1094_s11, %s1512_s10  ;;  %p1518_p12 = scmp.lt.s32.totalorder %s1512_s10, %s1512_s10 }
0x163e   :  { %p1519_p13 = por %p1518_p12, %p1517_p11 }
0x1640   :  { %p1520_p0 = pnand %p1519_p13, %p1513_p10 }
0x16f2   :  { %v1309_v51 = vpop.f32.mrb[8].mxu1 }
0x16f3   :  { %v1071_v52 = vadd.f32 %v1309_v51, %v1151_v50  ;;  %v1065_v53 = vpop.f32.mrb[9].mxu1 }
0x16f4   :  { %v1066_v54 = vadd.f32 %v1151_v50, %v1065_v53 }
0x16f5   :  { %vm1075_vm4 = vcmp.ge.f32.partialorder %v1071_v52, 0.0  ;;  %v1077_v55 = vmul.f32 0.01, %v1071_v52 }
0x16f6   :  { %vm1074_vm5 = vcmp.ge.f32.partialorder %v1066_v54, 0.0  ;;  %v1076_v56 = vmul.f32 0.01, %v1066_v54 }
0x16f7   :  { %v1079_v57 = vsel %vm1075_vm4, %v1071_v52, %v1077_v55 }
0x16f8   :  { %1081 = vst.msk [vmem:[#allocation7 + $0x8] sm:$0xff] %vm59_vm1, %v1079_v57  ;;  %v1078_v58 = vsel %vm1074_vm5, %v1066_v54, %v1076_v56 }
0x16f9   :  { %1080 = vst.msk [vmem:[#allocation7] sm:$0xff] %vm59_vm1, %v1078_v58 }
0x16fa   :  { %1523 = shalt.err (!%p1520_p0)
}
0x16fb   :  { %s1524_s13 = scalar_lea.hbm %s1820_s8, 256 }
0x16fc   :  { %p1525_p1 = scmp.ne.s32.totalorder %s1820_s8, %s1524_s13  ;;  %p1528_p2 = scmp.lt.u32.totalorder %s1524_s13, %s1820_s8 }
0x16fe   :  { %p1530_p3 = pnand %p1528_p2, %p1525_p1 }
0x1700   :  { %1533 = shalt.err (!%p1530_p3)
}
0x1701   :  { %1099 = dma.vmem_to_hbm [thread:$0]  %s1094_s11, 256, %s1820_s8, [#allocation6], %s1541_s23, %s1541_s23, %s1542_s24  }
0x1702   :  { %1536 = dma.done.wait [#allocation6], 256  }
0x1703   :  { %1537 = vsyncadd [#allocation6], 4294967040 }
0x1704   :  { %1538 = dma.done.wait [#allocation9], 64  }
0x1705   :  { %1539 = vsyncadd [#allocation9], 4294967232 }
0x1706   :  { %1129 = vsyncpa [#allocation5], 1 }
0x1707   :  { %1130 = vsyncpa [#allocation6], 1 }
0x1708   :  { %1131 = vsyncpa [#allocation9], 1 }

</bundles_post_ra>
